<compile_context>
chip_gen: v6e
topology: v6e:2x2x1
jax: 0.10.0
libtpu: 0.0.40
codegen_flags: <defaults>
</compile_context>

<pallas_src>
import functools

import jax
import jax.numpy as jnp
from jax import lax
from jax.experimental import pallas as pl
from jax.experimental.pallas import tpu as pltpu

_LANE = 128


def polychain_kernel(t_ref, out_ref, *, num_bends):
    # t_ref:   (1, T)         parameter values, lane axis = T
    # out_ref: (num_bends, T) basis weights, lane-dense when T % 128 == 0
    t_n = t_ref[...] * jnp.float32(num_bends - 1)                       # (1, T)
    k = lax.broadcasted_iota(jnp.int32, out_ref.shape, 0).astype(jnp.float32)
    out_ref[...] = jnp.maximum(jnp.float32(0.0), 1.0 - jnp.abs(t_n - k))


def make_polychain(num_bends: int):
    """Returns (forward, forward_batch) built on one Pallas kernel."""
    kernel = functools.partial(polychain_kernel, num_bends=num_bends)

    def _call(t_row):                                   # t_row: (1, T) float32
        T = t_row.shape[1]
        return pl.pallas_call(
            kernel,
            out_shape=jax.ShapeDtypeStruct((num_bends, T), jnp.float32),
            in_specs=[pl.BlockSpec(memory_space=pltpu.VMEM)],
            out_specs=pl.BlockSpec(memory_space=pltpu.VMEM),
        )(t_row)

    @jax.jit
    def forward(t):
        """Scalar t -> (num_bends,), matching the torch module exactly."""
        # Replicate t across one full lane tile so the store stays lane-dense;
        # the redundant per-lane compute is free on the VPU.
        t_row = jnp.full((1, _LANE), jnp.asarray(t, jnp.float32))
        return _call(t_row)[:, 0]

    @jax.jit
    def forward_batch(ts):
        """(T,) of t values -> (T, num_bends) basis weights in one launch."""
        T = ts.shape[0]
        t_pad = ((T + _LANE - 1) // _LANE) * _LANE
        t_row = jnp.zeros((1, t_pad), jnp.float32).at[0, :T].set(
            ts.astype(jnp.float32))
        return _call(t_row)[:, :T].T

    return forward, forward_batch


if __name__ == "__main__":
    num_bends = 8
    forward, forward_batch = make_polychain(num_bends)

    key = jax.random.PRNGKey(0)
    k_scalar, k_batch = jax.random.split(key)

    rng = jnp.arange(0, float(num_bends), dtype=jnp.float32)

    def ref_fn(t):
        t_n = t.astype(jnp.float32) * (num_bends - 1)
        return jnp.maximum(jnp.float32(0.0), 1.0 - jnp.abs(t_n - rng))

    # Scalar path (matches the torch module's forward(t) signature).
    t = jax.random.uniform(k_scalar, (), dtype=jnp.float32)
    out = forward(t)
    jax.block_until_ready(out)
    assert out.shape == (num_bends,)
    assert jnp.allclose(out, ref_fn(t), rtol=1e-6, atol=1e-6)

    # Batched path: 128 t values, lane-dense output, one pallas_call.
    ts = jax.random.uniform(k_batch, (128,), dtype=jnp.float32)
    out_b = forward_batch(ts)
    jax.block_until_ready(out_b)
    assert out_b.shape == (128, num_bends)
    assert jnp.allclose(out_b, jax.vmap(ref_fn)(ts), rtol=1e-6, atol=1e-6)

    # Ragged batch + knot endpoints (exercises the lane-padding path).
    ts_edge = jnp.array([0.0, 1.0, 0.5], dtype=jnp.float32)
    out_e = forward_batch(ts_edge)
    jax.block_until_ready(out_e)
    assert jnp.allclose(out_e, jax.vmap(ref_fn)(ts_edge), rtol=1e-6, atol=1e-6)

    print("KERNEL_OK")
</pallas_src>

<mosaic_0001>
module attributes {stable_mosaic.version = 11 : i64} {
  func.func @polychain_kernel(%arg0: memref<1x128xf32, #tpu.memory_space<vmem>>, %arg1: memref<8x128xf32, #tpu.memory_space<vmem>>) attributes {dimension_semantics = [], scalar_prefetch = 0 : i64, scratch_operands = 0 : i64, tpu.core_type = #tpu.core_type<tc>} {
    %c0 = arith.constant 0 : index
    %c0_0 = arith.constant 0 : index
    %0 = vector.load %arg0[%c0, %c0_0] : memref<1x128xf32, #tpu.memory_space<vmem>>, vector<1x128xf32>
    %cst = arith.constant 7.000000e+00 : f32
    %1 = vector.broadcast %cst : f32 to vector<1x128xf32>
    %2 = arith.mulf %0, %1 : vector<1x128xf32>
    %3 = tpu.iota {dimensions = array<i32: 0>} : vector<8x128xi32>
    %4 = arith.sitofp %3 : vector<8x128xi32> to vector<8x128xf32>
    %5 = vector.broadcast %2 : vector<1x128xf32> to vector<8x128xf32>
    %6 = arith.subf %5, %4 : vector<8x128xf32>
    %7 = math.absf %6 : vector<8x128xf32>
    %cst_1 = arith.constant 1.000000e+00 : f32
    %8 = vector.broadcast %cst_1 : f32 to vector<8x128xf32>
    %9 = arith.subf %8, %7 : vector<8x128xf32>
    %cst_2 = arith.constant 0.000000e+00 : f32
    %10 = vector.broadcast %cst_2 : f32 to vector<8x128xf32>
    %11 = arith.maximumf %10, %9 : vector<8x128xf32>
    %c0_3 = arith.constant 0 : index
    %c0_4 = arith.constant 0 : index
    %12 = vector.load %arg1[%c0_3, %c0_4] : memref<8x128xf32, #tpu.memory_space<vmem>>, vector<8x128xf32>
    tpu.vector_store %arg1[%c0_3, %c0_4], %11 {strides = array<i32>} : memref<8x128xf32, #tpu.memory_space<vmem>>, vector<8x128xf32>,
    return
  }
}

</mosaic_0001>

<bundles_post_ra>
// kernel: forward.1
= control target key start
LH: loop header
LB: loop body
LE: loop exit
PB: predicated region body
PF: predicated region fallthrough
CT: control target
= control target key end

     0   :  { %v10_v0 = vlaneseq  ;;  %s44_s0 = inlined_call_operand.vmem [shape: f32[1,128], index: 0, kind: input, shape index: {}]   ;;  %s45_s1 = inlined_call_operand.vmem [shape: f32[8,128], index: 1, kind: output, shape index: {}]  }
   0x1   :  { %v8_v1 = vld [vmem:[%s44_s0] sm:$0x1] }
   0x2   :  { %v9_v2 = vmul.f32 7.0, %v8_v1  ;;  %v11_v3 = vshrl.u32 %v10_v0, 7 }
   0x4   :  { %v12_v4 = vcvt.s32.f32 %v11_v3  ;;  %v16_v5 = vsub.s32 0, %v11_v3 }
   0x6   :  { %v17_v6 = vrot.slane %v9_v2, %v16_v5 }
   0x8   :  { %v19_v7 = vsub.f32 %v17_v6, %v12_v4 }
   0xa   :  { %v20_v8 = vand.u32 2147483647, %v19_v7 }
   0xc   :  { %v21_v9 = vsub.f32 1.0, %v20_v8 }
   0xe   :  { %v22_v10 = vmax.f32 %v21_v9, 0.0 }
  0x10   :  { %23 = vst [vmem:[%s45_s1] sm:$0xff] %v22_v10 }

</bundles_post_ra>
